<compile_context>
chip_gen: v6e
topology: v6e:2x2x1
jax: 0.10.0
libtpu: 0.0.40
codegen_flags: <defaults>
</compile_context>

<pallas_src>
import jax
import jax.numpy as jnp
from jax.experimental import pallas as pl
from jax.experimental.pallas import tpu as pltpu

_LANES = 128
_TARGET_BLOCK_BYTES = 4 * 1024 * 1024     # ~4 MiB blocks: >=85% HBM roofline
_VMEM_LIMIT_BYTES = 48 * 1024 * 1024      # explicit: > v5e 16 MiB scoped default,
                                          # < v7x 64 MiB physical VMEM


def _default_min_pallas_elems():
    """Below this many elements, XLA's fused add beats kernel launch + DMA."""
    try:
        kind = jax.devices()[0].device_kind.lower()
        if "v7" in kind:
            # Faster HBM + 2 TCs move the crossover to larger problems.
            return 256 * 1024
    except Exception:
        pass
    return 64 * 1024


def _sublane(dtype):
    # 8 sublanes of 32-bit; sub-32-bit dtypes pack along sublanes (bf16 -> 16).
    return 8 * max(1, 4 // jnp.dtype(dtype).itemsize)


def _pick_tile_rows(num_rows, row_bytes, sublane, target_block_bytes):
    """Rows per block targeting ~target_block_bytes blocks."""
    tile = max(sublane,
               (target_block_bytes // max(row_bytes, 1)) // sublane * sublane)
    if num_rows >= sublane:
        tile = min(tile, (num_rows // sublane) * sublane)
    else:
        # Tiny row extent: single full-extent block (caller trims pe to match).
        tile = num_rows
    return tile


def _add_pe_kernel(x_ref, pe_ref, o_ref):
    # Elementwise (broadcasting) add; pe cast per-tile on the VPU (free in a
    # mem-bound kernel) instead of a wrapper-wide pass over the parameter.
    o_ref[...] = x_ref[...] + pe_ref[...].astype(x_ref.dtype)


def _batch_tiled_add(x, pe, target_block_bytes, vmem_limit):
    """Small-S path: x/out blocks (tb, S, D); pe block (1, S, D) stays resident."""
    B, S, D = x.shape
    pe_s = pe[:, :S, :]  # slice is tiny on this path (S*D small by dispatch)

    if D % _LANES != 0 and (S * D) % _LANES == 0:
        # Lane-dense fold so stores use all 128 lanes.
        R = (S * D) // _LANES
        x_in = x.reshape(B, R, _LANES)
        pe_in = pe_s.reshape(1, R, _LANES)
        Sb, Db = R, _LANES
    else:
        x_in, pe_in = x, pe_s
        Sb, Db = S, D

    itemsize = x.dtype.itemsize
    tb = max(1, target_block_bytes // max(1, Sb * Db * itemsize))
    tb = min(tb, B)

    out = pl.pallas_call(
        _add_pe_kernel,
        out_shape=jax.ShapeDtypeStruct((B, Sb, Db), x.dtype),
        grid_spec=pltpu.PrefetchScalarGridSpec(
            num_scalar_prefetch=0,
            grid=(pl.cdiv(B, tb),),
            in_specs=[
                pl.BlockSpec((tb, Sb, Db), lambda i: (i, 0, 0)),
                pl.BlockSpec((1, Sb, Db), lambda i: (0, 0, 0)),   # resident pe
            ],
            out_specs=pl.BlockSpec((tb, Sb, Db), lambda i: (i, 0, 0)),
        ),
        compiler_params=pltpu.CompilerParams(
            dimension_semantics=("parallel",),
            vmem_limit_bytes=vmem_limit,
        ),
    )(x_in, pe_in)
    return out.reshape(B, S, D)


def _row_tiled_add(x, pe, target_block_bytes, vmem_limit):
    """x: (B, S, D); pe: (1, max_len, D).  Tile S (outer), batch innermost."""
    B, S, D = x.shape
    sub = _sublane(x.dtype)
    itemsize = x.dtype.itemsize

    # Lane-axis split only if even a sublane-height full-width block would blow
    # the per-block budget (very wide d_model).  Only possible for D % 128 == 0;
    # for non-128-multiple huge D we accept the larger block (rare).
    td = D
    if D % _LANES == 0 and sub * D * itemsize > target_block_bytes:
        td = max(_LANES,
                 (target_block_bytes // (sub * itemsize)) // _LANES * _LANES)

    ts = _pick_tile_rows(S, td * itemsize, sub, target_block_bytes)
    pe_in = pe
    if ts % sub != 0:
        # Ragged full-extent seq block: trim pe so "block == full dim" holds.
        pe_in = pe[:, :S, :]

    return pl.pallas_call(
        _add_pe_kernel,
        out_shape=jax.ShapeDtypeStruct((B, S, D), x.dtype),
        grid_spec=pltpu.PrefetchScalarGridSpec(
            num_scalar_prefetch=0,
            # Sequence (and D) tiles outer, batch innermost: pe block index is
            # constant across consecutive batch steps -> stays resident in VMEM.
            grid=(pl.cdiv(S, ts), pl.cdiv(D, td), B),
            in_specs=[
                pl.BlockSpec((pl.Squeezed(), ts, td), lambda s, d, b: (b, s, d)),
                pl.BlockSpec((pl.Squeezed(), ts, td), lambda s, d, b: (0, s, d)),
            ],
            out_specs=pl.BlockSpec((pl.Squeezed(), ts, td),
                                   lambda s, d, b: (b, s, d)),
        ),
        compiler_params=pltpu.CompilerParams(
            dimension_semantics=("parallel", "parallel", "arbitrary"),
            vmem_limit_bytes=vmem_limit,
        ),
    )(x, pe_in)


def _lane_dense_add(x, pe, target_block_bytes, vmem_limit):
    """D % 128 != 0 but (S*D) % 128 == 0: fold (S, D) -> (R, 128) rows."""
    B, S, D = x.shape
    max_len = pe.shape[1]
    R = (S * D) // _LANES

    x2 = x.reshape(B, R, _LANES)
    if (max_len * D) % _LANES == 0:
        # Zero-copy whole-parameter reshape; first R rows == pe[:, :S, :] flat.
        pe2 = pe.reshape((max_len * D) // _LANES, _LANES)
    else:
        # TODO(synk): pad max_len at parameter-init time so this slice-copy
        # (an extra HBM read+write of S*D elements) never happens.
        pe2 = pe[0, :S, :].reshape(R, _LANES)

    sub = _sublane(x.dtype)
    tr = _pick_tile_rows(R, _LANES * x.dtype.itemsize, sub, target_block_bytes)
    if tr % sub != 0:
        pe2 = pe2[:R]  # tiny; makes the full-extent block legal for pe too

    out = pl.pallas_call(
        _add_pe_kernel,
        out_shape=jax.ShapeDtypeStruct((B, R, _LANES), x.dtype),
        grid_spec=pltpu.PrefetchScalarGridSpec(
            num_scalar_prefetch=0,
            grid=(pl.cdiv(R, tr), B),            # row tiles outer, batch inner
            in_specs=[
                pl.BlockSpec((pl.Squeezed(), tr, _LANES), lambda r, b: (b, r, 0)),
                pl.BlockSpec((tr, _LANES), lambda r, b: (r, 0)),   # resident pe
            ],
            out_specs=pl.BlockSpec((pl.Squeezed(), tr, _LANES),
                                   lambda r, b: (b, r, 0)),
        ),
        compiler_params=pltpu.CompilerParams(
            dimension_semantics=("parallel", "arbitrary"),
            vmem_limit_bytes=vmem_limit,
        ),
    )(x2, pe2)
    return out.reshape(B, S, D)


def dynamic_positional_encoding(x, pe, *, min_pallas_elems=None,
                                target_block_bytes=_TARGET_BLOCK_BYTES,
                                vmem_limit_bytes=_VMEM_LIMIT_BYTES):
    """x: (B, S, D); pe: (1, max_len, D).  Returns x + pe[:, :S, :]."""
    B, S, D = x.shape
    if S > pe.shape[1]:
        raise ValueError(f"sequence length {S} exceeds max_len {pe.shape[1]}")
    if min_pallas_elems is None:
        min_pallas_elems = _default_min_pallas_elems()

    if B * S * D < min_pallas_elems:
        # Tiny problem: let XLA fuse the add; kernel overhead would dominate.
        return x + pe[:, :S, :].astype(x.dtype)

    itemsize = x.dtype.itemsize
    # Small per-batch slab: batch-tiled path (pe resident, overhead amortized
    # over many batch elements per grid step).
    if S * D * itemsize <= target_block_bytes // 2:
        return _batch_tiled_add(x, pe, target_block_bytes, vmem_limit_bytes)

    if D % _LANES == 0:
        return _row_tiled_add(x, pe, target_block_bytes, vmem_limit_bytes)
    if (S * D) % _LANES == 0:
        return _lane_dense_add(x, pe, target_block_bytes, vmem_limit_bytes)
    # d_model < 128 and S*D not lane-aligned: accept masked stores.
    return _row_tiled_add(x, pe, target_block_bytes, vmem_limit_bytes)


if __name__ == "__main__":
    key = jax.random.PRNGKey(0)
    kx, kpe, kx2, kpe2 = jax.random.split(key, 4)
    max_len = 1000

    # Case 1: module-sized small shapes (batch=2, seq=8, d_model=32); force the
    # Pallas path -> batch-tiled fast path with lane-dense fold (S*D = 256).
    B, S, D = 2, 8, 32
    x = jax.random.normal(kx, (B, S, D), dtype=jnp.float32)
    pe = jax.random.normal(kpe, (1, max_len, D), dtype=jnp.float32) * 0.02
    out = jax.block_until_ready(dynamic_positional_encoding(x, pe, min_pallas_elems=0))
    ref = x + pe[:, :S, :]
    assert out.shape == (B, S, D)
    assert jnp.allclose(out, ref, atol=1e-6), "batch-tiled path mismatch"

    # Case 2: lane-aligned d_model; small block budget forces the row-tiled
    # path (seq tiles outer, batch inner, resident pe tile).
    B2, S2, D2 = 2, 64, 128
    x2 = jax.random.normal(kx2, (B2, S2, D2), dtype=jnp.float32)
    pe2 = jax.random.normal(kpe2, (1, max_len, D2), dtype=jnp.float32) * 0.02
    out2 = jax.block_until_ready(
        dynamic_positional_encoding(x2, pe2, min_pallas_elems=0,
                                    target_block_bytes=16 * 1024))
    assert jnp.allclose(out2, x2 + pe2[:, :S2, :], atol=1e-6), "row-tiled path mismatch"

    # Case 3: small d_model, big enough slab (via tiny block budget) -> the
    # lane-dense fold path with the zero-copy pe reshape.
    out3 = jax.block_until_ready(
        dynamic_positional_encoding(x, pe, min_pallas_elems=0,
                                    target_block_bytes=4 * 1024))
    assert jnp.allclose(out3, ref, atol=1e-6), "lane-dense path mismatch"

    # Case 4: default behaviour on tiny inputs (XLA fused add fallback).
    out4 = jax.block_until_ready(dynamic_positional_encoding(x, pe))
    assert jnp.allclose(out4, ref, atol=1e-6), "fallback path mismatch"

    print("KERNEL_OK")
</pallas_src>

<mosaic_0001>
module attributes {stable_mosaic.version = 11 : i64} {
  func.func @_add_pe_kernel(%arg0: i32, %arg1: memref<2x2x128xf32, #tpu.memory_space<vmem>>, %arg2: memref<1x2x128xf32, #tpu.memory_space<vmem>>, %arg3: memref<2x2x128xf32, #tpu.memory_space<vmem>>) attributes {dimension_semantics = [#tpu.dimension_semantics<parallel>], iteration_bounds = array<i64: 1>, scalar_prefetch = 0 : i64, scratch_operands = 0 : i64, tpu.core_type = #tpu.core_type<tc>, window_params = [{transform_indices = @transform_0, window_bounds = array<i64: 2, 2, 128>}, {pipeline_mode = #tpu.pipeline_mode<synchronous>, transform_indices = @transform_1, window_bounds = array<i64: 1, 2, 128>}, {transform_indices = @transform_2, window_bounds = array<i64: 2, 2, 128>}]} {
    %c0 = arith.constant 0 : index
    %c0_0 = arith.constant 0 : index
    %c0_1 = arith.constant 0 : index
    %0 = vector.load %arg1[%c0, %c0_0, %c0_1] : memref<2x2x128xf32, #tpu.memory_space<vmem>>, vector<2x2x128xf32>
    %c0_2 = arith.constant 0 : index
    %c0_3 = arith.constant 0 : index
    %c0_4 = arith.constant 0 : index
    %1 = vector.load %arg2[%c0_2, %c0_3, %c0_4] : memref<1x2x128xf32, #tpu.memory_space<vmem>>, vector<1x2x128xf32>
    %2 = vector.broadcast %1 : vector<1x2x128xf32> to vector<2x2x128xf32>
    %3 = arith.addf %0, %2 : vector<2x2x128xf32>
    %c0_5 = arith.constant 0 : index
    %c0_6 = arith.constant 0 : index
    %c0_7 = arith.constant 0 : index
    %4 = vector.load %arg3[%c0_5, %c0_6, %c0_7] : memref<2x2x128xf32, #tpu.memory_space<vmem>>, vector<2x2x128xf32>
    tpu.vector_store %arg3[%c0_5, %c0_6, %c0_7], %3 {strides = array<i32>} : memref<2x2x128xf32, #tpu.memory_space<vmem>>, vector<2x2x128xf32>,
    return
  }
  func.func @transform_0(%arg0: i32) -> (i32, i32, i32) {
    %c0_i32 = arith.constant 0 : i32
    %c0_i32_0 = arith.constant 0 : i32
    %c0_i32_1 = arith.constant 0 : i32
    return %arg0, %c0_i32, %c0_i32_0 : i32, i32, i32
  }
  func.func @transform_1(%arg0: i32) -> (i32, i32, i32) {
    %c0_i32 = arith.constant 0 : i32
    %c0_i32_0 = arith.constant 0 : i32
    %c0_i32_1 = arith.constant 0 : i32
    %c0_i32_2 = arith.constant 0 : i32
    return %c0_i32, %c0_i32_0, %c0_i32_1 : i32, i32, i32
  }
  func.func @transform_2(%arg0: i32) -> (i32, i32, i32) {
    %c0_i32 = arith.constant 0 : i32
    %c0_i32_0 = arith.constant 0 : i32
    %c0_i32_1 = arith.constant 0 : i32
    return %arg0, %c0_i32, %c0_i32_0 : i32, i32, i32
  }
}

</mosaic_0001>

<bundles_post_ra>
// kernel: tpu_custom_call.1
= control target key start
LH: loop header
LB: loop body
LE: loop exit
PB: predicated region body
PF: predicated region fallthrough
CT: control target
= control target key end

     0   :  { %7 = vsyncpa [#allocation3], 0  ;;  %s169_s0 = inlined_call_operand.hbm [shape: f32[2,2,128], index: 0, kind: input, shape index: {}]   ;;  %s170_s1 = inlined_call_operand.hbm [shape: f32[1,2,128], index: 1, kind: input, shape index: {}]   ;;  %s171_s2 = inlined_call_operand.hbm [shape: f32[2,2,128], index: 2, kind: output, shape index: {}]  }
   0x1   :  { %8 = vsyncpa [#allocation6], 0 }
   0x2   :  { %9 = vsyncpa [#allocation4], 0  ;;  %s134_s9 = smov [#allocation2]  }
   0x3   :  { %s15_s10 = sshll.u32 %s134_s9, 4  ;;  %s16_s10 = int_to_ptr.vmem [resolvable:$true] %s15_s10 }
   0x4   :  { %s76_s11 = scalar_lea.vmem %s16_s10, 64  ;;  %p81_p1 = scmp.lt.s32.totalorder %s16_s10, %s16_s10 }
   0x5   :  { %p77_p0 = scmp.ne.s32.totalorder %s16_s10, %s76_s11  ;;  %p82_p2 = scmp.lt.s32.totalorder %s76_s11, %s76_s11 }
   0x7   :  { %p83_p3 = por %p82_p2, %p81_p1 }
   0x9   :  { %p84_p4 = pnand %p83_p3, %p77_p0 }
   0xb   :  { %87 = shalt.err (!%p84_p4)
}
   0xc   :  { %s135_s12 = smov 32   ;;  %s136_s13 = smov 2  }
   0xd   :  { %21 = dma.hbm_to_vmem [thread:$0]  %s169_s0, 64, %s16_s10, [#allocation3], %s135_s12, %s135_s12, %s136_s13  }
   0xe   :  { %s137_s16 = smov [#allocation5]  }
   0xf   :  { %s28_s17 = sshll.u32 %s137_s16, 4  ;;  %s29_s17 = int_to_ptr.vmem [resolvable:$true] %s28_s17 }
  0x10   :  { %s96_s18 = scalar_lea.vmem %s29_s17, 32  ;;  %p101_p6 = scmp.lt.s32.totalorder %s29_s17, %s29_s17 }
  0x11   :  { %p97_p5 = scmp.ne.s32.totalorder %s29_s17, %s96_s18  ;;  %p102_p7 = scmp.lt.s32.totalorder %s96_s18, %s96_s18 }
  0x13   :  { %p103_p8 = por %p102_p7, %p101_p6 }
  0x15   :  { %p104_p9 = pnand %p103_p8, %p97_p5 }
  0x17   :  { %107 = shalt.err (!%p104_p9)
}
  0x18   :  { %31 = dma.hbm_to_vmem [thread:$0]  %s170_s1, 32, %s29_s17, [#allocation6]  }
  0x19   :  { %128 = dma.done.wait [#allocation3], 64  }
  0x1a   :  { %129 = vsyncadd [#allocation3], 4294967232 }
  0x1b   :  { %130 = dma.done.wait [#allocation6], 32  }
  0x1c   :  { %131 = vsyncadd [#allocation6], 4294967264  ;;  %s138_s21 = smov [#allocation7]   ;;  %v38_v0 = vld [vmem:[#allocation2] sm:$0x3] }
  0x1d   :  { %s50_s0 = sshll.u32 %s138_s21, 4  ;;  %v40_v1 = vld [vmem:[#allocation5] sm:$0x3]  ;;  %v39_v2 = vld [vmem:[#allocation2 + $0x2] sm:$0x3]  ;;  %s51_s0 = int_to_ptr.vmem [resolvable:$true] %s50_s0 }
  0x1e   :  { %v41_v3 = vadd.f32 %v40_v1, %v38_v0  ;;  %v42_v4 = vadd.f32 %v40_v1, %v39_v2  ;;  %s108_s22 = scalar_lea.vmem %s51_s0, 64  ;;  %p113_p11 = scmp.lt.s32.totalorder %s51_s0, %s51_s0 }
  0x1f   :  { %p109_p10 = scmp.ne.s32.totalorder %s51_s0, %s108_s22  ;;  %p114_p12 = scmp.lt.s32.totalorder %s108_s22, %s108_s22 }
  0x20   :  { %43 = vst [vmem:[#allocation7] sm:$0x3] %v41_v3  ;;  %44 = vst [vmem:[#allocation7 + $0x2] sm:$0x3] %v42_v4 }
  0x21   :  { %p115_p13 = por %p114_p12, %p113_p11 }
  0x23   :  { %p116_p0 = pnand %p115_p13, %p109_p10 }
  0x25   :  { %119 = shalt.err (!%p116_p0)
}
  0x26   :  { %56 = dma.vmem_to_hbm [thread:$0]  %s51_s0, 64, %s171_s2, [#allocation4], %s135_s12, %s135_s12, %s136_s13  }
  0x27   :  { %132 = dma.done.wait [#allocation4], 64  }
  0x28   :  { %133 = vsyncadd [#allocation4], 4294967232 }
  0x29   :  { %60 = vsyncpa [#allocation3], 1 }
  0x2a   :  { %61 = vsyncpa [#allocation6], 1 }
  0x2b   :  { %62 = vsyncpa [#allocation4], 1 }

</bundles_post_ra>
